<compile_context>
chip_gen: v7x
topology: tpu7x:2x2x1
jax: 0.10.0
libtpu: 0.0.40
codegen_flags: <defaults>
</compile_context>

<pallas_src>
import functools

import jax
import jax.numpy as jnp
from jax import lax
from jax.experimental import pallas as pl
from jax.experimental.pallas import tpu as pltpu


# ----------------------------- Pass 1: center --------------------------------
def _center_kernel(mask_ref, emb_ref, center_ref, acc_ref, cnt_ref):
    # mask_ref: (B, tn)  emb_ref: (tn, E)  center_ref: (B, E)
    # acc_ref:  (B, E) f32 scratch     cnt_ref: (B, 1) f32 scratch
    k = pl.program_id(0)

    @pl.when(k == 0)
    def _init():
        acc_ref[...] = jnp.zeros_like(acc_ref)
        cnt_ref[...] = jnp.zeros_like(cnt_ref)

    mask = mask_ref[...]
    emb = emb_ref[...]

    # Partial items_center_sum for this N-tile (MXU, f32 accumulation).
    acc_ref[...] += jnp.dot(mask, emb, preferred_element_type=jnp.float32)
    # Partial items_num for this N-tile (exact: 0/1 values summed in f32).
    cnt_ref[...] += jnp.sum(mask.astype(jnp.float32), axis=1, keepdims=True)

    @pl.when(k == pl.num_programs(0) - 1)
    def _finalize():
        # Clamp: reference would produce inf/NaN for an all-empty bundle row.
        cnt = jnp.maximum(cnt_ref[...], 1.0)
        inv = pl.reciprocal(cnt, approx=True)          # EUP, effectively free
        center_ref[...] = (acc_ref[...] * inv).astype(center_ref.dtype)


# ----------------------------- Pass 2: scores --------------------------------
def _score_kernel(center_ref, emb_ref, out_ref):
    # center_ref: (B, E)  emb_ref: (tn, E)  out_ref: (B, tn)
    center = center_ref[...]
    emb = emb_ref[...]
    # center @ emb.T without materializing a transpose: contract E with E.
    scores = lax.dot_general(
        center, emb,
        dimension_numbers=(((1,), (1,)), ((), ())),
        preferred_element_type=jnp.float32,
    )
    out_ref[...] = scores.astype(out_ref.dtype)


# ------------------------------- Wrapper --------------------------------------
def _pick_tile(n, desired):
    """Largest multiple of 128 <= desired that divides n, else full extent."""
    t = min(desired, n)
    t = (t // 128) * 128
    while t >= 128 and n % t != 0:
        t -= 128
    if t < 128 or n % t != 0:
        t = n  # fall back to a single full-extent block
    return t


_VMEM_LIMIT = 32 * 1024 * 1024  # explicit budget; safe on v5e/v6e/v7x


def itemknn_forward(items_id_mask, items_embedding, *, tn=512,
                    compute_dtype=jnp.bfloat16):
    B, N = items_id_mask.shape
    N2, E = items_embedding.shape
    assert N == N2, "mask item dim must match embedding rows"

    tn = _pick_tile(N, tn)
    num_tiles = N // tn

    mask_c = items_id_mask.astype(compute_dtype)
    emb_c = items_embedding.astype(compute_dtype)

    # ---- Pass 1: streamed reduction over N -> bundle centers (B, E) ----
    center = pl.pallas_call(
        _center_kernel,
        out_shape=jax.ShapeDtypeStruct((B, E), compute_dtype),
        grid_spec=pltpu.PrefetchScalarGridSpec(
            num_scalar_prefetch=0,
            grid=(num_tiles,),
            in_specs=[
                pl.BlockSpec((B, tn), lambda k: (0, k)),   # mask N-tile
                pl.BlockSpec((tn, E), lambda k: (k, 0)),   # emb N-tile
            ],
            out_specs=pl.BlockSpec((B, E), lambda k: (0, 0)),  # resident acc out
            scratch_shapes=[
                pltpu.VMEM((B, E), jnp.float32),   # center_sum accumulator
                pltpu.VMEM((B, 1), jnp.float32),   # items_num accumulator
            ],
        ),
        compiler_params=pltpu.CompilerParams(
            dimension_semantics=("arbitrary",),            # reduction axis
            vmem_limit_bytes=_VMEM_LIMIT,
        ),
    )(mask_c, emb_c)

    # ---- Pass 2: streamed scoring over N -> scores (B, N) ----
    scores = pl.pallas_call(
        _score_kernel,
        out_shape=jax.ShapeDtypeStruct((B, N), jnp.float32),
        grid_spec=pltpu.PrefetchScalarGridSpec(
            num_scalar_prefetch=0,
            grid=(num_tiles,),
            in_specs=[
                pl.BlockSpec((B, E), lambda j: (0, 0)),    # center, resident
                pl.BlockSpec((tn, E), lambda j: (j, 0)),   # emb N-tile
            ],
            out_specs=pl.BlockSpec((B, tn), lambda j: (0, j)),  # lane-dense out
        ),
        compiler_params=pltpu.CompilerParams(
            dimension_semantics=("parallel",),             # megacore on v7x
            vmem_limit_bytes=_VMEM_LIMIT,
        ),
    )(center, emb_c)

    return scores


def reference_forward(items_id_mask, items_embedding):
    center_sum = items_id_mask @ items_embedding
    items_num = jnp.sum(items_id_mask, axis=1, keepdims=True)
    center = center_sum / items_num
    return center @ items_embedding.T


if __name__ == "__main__":
    # Small shapes consistent with the module, but large enough in N to
    # exercise the tiled two-pass pipeline (4 tiles of 512 per pass).
    B = 8            # number of bundles (batch)
    N_ITEMS = 2048   # conf['num_items']
    EMB_SIZE = 128   # conf['emb_size']

    key = jax.random.PRNGKey(0)
    k_emb, k_mask = jax.random.split(key)

    # Deterministic xavier_uniform-style init for items_embedding.
    bound = (6.0 / (N_ITEMS + EMB_SIZE)) ** 0.5
    items_embedding = jax.random.uniform(
        k_emb, (N_ITEMS, EMB_SIZE), dtype=jnp.float32, minval=-bound, maxval=bound
    )

    # Binary bundle membership mask (B, n_items); guarantee >=1 item per row
    # (matches the reference's implicit precondition; kernel clamps anyway).
    mask = jax.random.bernoulli(k_mask, p=0.05, shape=(B, N_ITEMS)).astype(jnp.float32)
    mask = mask.at[:, 0].set(1.0)

    fwd = jax.jit(functools.partial(itemknn_forward, tn=512,
                                    compute_dtype=jnp.bfloat16))
    scores = fwd(mask, items_embedding)
    scores = jax.block_until_ready(scores)

    ref = reference_forward(mask, items_embedding)
    assert scores.shape == (B, N_ITEMS)
    # bf16 inputs / approx reciprocal -> loosened (but still tight) tolerance.
    assert jnp.allclose(scores, ref, atol=5e-3, rtol=5e-2), "mismatch vs reference"

    print("KERNEL_OK")
</pallas_src>

<mosaic_0001>
module attributes {stable_mosaic.version = 11 : i64} {
  func.func @_center_kernel(%arg0: i32, %arg1: memref<8x512xbf16, #tpu.memory_space<vmem>>, %arg2: memref<512x128xbf16, #tpu.memory_space<vmem>>, %arg3: memref<8x128xbf16, #tpu.memory_space<vmem>>, %arg4: memref<8x128xf32, #tpu.memory_space<vmem>>, %arg5: memref<8x1xf32, #tpu.memory_space<vmem>>) attributes {dimension_semantics = [#tpu.dimension_semantics<arbitrary>], iteration_bounds = array<i64: 4>, scalar_prefetch = 0 : i64, scratch_operands = 2 : i64, tpu.core_type = #tpu.core_type<tc>, window_params = [{transform_indices = @transform_0, window_bounds = array<i64: 8, 512>}, {transform_indices = @transform_1, window_bounds = array<i64: 512, 128>}, {pipeline_mode = #tpu.pipeline_mode<synchronous>, transform_indices = @transform_2, window_bounds = array<i64: 8, 128>}]} {
    %c0_i32 = arith.constant 0 : i32
    %0 = arith.cmpi eq, %arg0, %c0_i32 : i32
    %1 = arith.extui %0 : i1 to i32
    %c0_i32_0 = arith.constant 0 : i32
    %2 = arith.cmpi ne, %1, %c0_i32_0 : i32
    scf.if %2 {
      %cst_14 = arith.constant 0.000000e+00 : f32
      %18 = vector.broadcast %cst_14 : f32 to vector<8x128xf32>
      %c0_15 = arith.constant 0 : index
      %c0_16 = arith.constant 0 : index
      %19 = vector.load %arg4[%c0_15, %c0_16] : memref<8x128xf32, #tpu.memory_space<vmem>>, vector<8x128xf32>
      tpu.vector_store %arg4[%c0_15, %c0_16], %18 {strides = array<i32>} : memref<8x128xf32, #tpu.memory_space<vmem>>, vector<8x128xf32>,
      %cst_17 = arith.constant 0.000000e+00 : f32
      %20 = vector.broadcast %cst_17 : f32 to vector<8x1xf32>
      %c0_18 = arith.constant 0 : index
      %c0_19 = arith.constant 0 : index
      %21 = vector.load %arg5[%c0_18, %c0_19] : memref<8x1xf32, #tpu.memory_space<vmem>>, vector<8x1xf32>
      tpu.vector_store %arg5[%c0_18, %c0_19], %20 {strides = array<i32>} : memref<8x1xf32, #tpu.memory_space<vmem>>, vector<8x1xf32>,
    } else {
    }
    %c0 = arith.constant 0 : index
    %c0_1 = arith.constant 0 : index
    %3 = vector.load %arg1[%c0, %c0_1] : memref<8x512xbf16, #tpu.memory_space<vmem>>, vector<8x512xbf16>
    %c0_2 = arith.constant 0 : index
    %c0_3 = arith.constant 0 : index
    %4 = vector.load %arg2[%c0_2, %c0_3] : memref<512x128xbf16, #tpu.memory_space<vmem>>, vector<512x128xbf16>
    %c0_4 = arith.constant 0 : index
    %c0_5 = arith.constant 0 : index
    %5 = vector.load %arg4[%c0_4, %c0_5] : memref<8x128xf32, #tpu.memory_space<vmem>>, vector<8x128xf32>
    %cst = arith.constant dense<0.000000e+00> : vector<8x128xf32>
    %6 = tpu.matmul %3, %4, %cst {dimension_numbers = #tpu.dot_dimension_numbers<[1], [0], [0], [1], [0, 0, 1, 1], [], []>} : vector<8x512xbf16>, vector<512x128xbf16>, vector<8x128xf32> -> vector<8x128xf32>
    %7 = arith.addf %5, %6 : vector<8x128xf32>
    %c0_6 = arith.constant 0 : index
    %c0_7 = arith.constant 0 : index
    %8 = vector.load %arg4[%c0_6, %c0_7] : memref<8x128xf32, #tpu.memory_space<vmem>>, vector<8x128xf32>
    tpu.vector_store %arg4[%c0_6, %c0_7], %7 {strides = array<i32>} : memref<8x128xf32, #tpu.memory_space<vmem>>, vector<8x128xf32>,
    %c0_8 = arith.constant 0 : index
    %c0_9 = arith.constant 0 : index
    %9 = vector.load %arg5[%c0_8, %c0_9] : memref<8x1xf32, #tpu.memory_space<vmem>>, vector<8x1xf32>
    %10 = arith.extf %3 : vector<8x512xbf16> to vector<8x512xf32>
    %cst_10 = arith.constant dense<0.000000e+00> : vector<8xf32>
    %11 = vector.multi_reduction <add>, %10, %cst_10 [1] : vector<8x512xf32> to vector<8xf32>
    %12 = vector.shape_cast %11 : vector<8xf32> to vector<8x1xf32>
    %13 = arith.addf %9, %12 : vector<8x1xf32>
    %c0_11 = arith.constant 0 : index
    %c0_12 = arith.constant 0 : index
    %14 = vector.load %arg5[%c0_11, %c0_12] : memref<8x1xf32, #tpu.memory_space<vmem>>, vector<8x1xf32>
    tpu.vector_store %arg5[%c0_11, %c0_12], %13 {strides = array<i32>} : memref<8x1xf32, #tpu.memory_space<vmem>>, vector<8x1xf32>,
    %c3_i32 = arith.constant 3 : i32
    %15 = arith.cmpi eq, %arg0, %c3_i32 : i32
    %16 = arith.extui %15 : i1 to i32
    %c0_i32_13 = arith.constant 0 : i32
    %17 = arith.cmpi ne, %16, %c0_i32_13 : i32
    scf.if %17 {
      %c0_14 = arith.constant 0 : index
      %c0_15 = arith.constant 0 : index
      %18 = vector.load %arg5[%c0_14, %c0_15] : memref<8x1xf32, #tpu.memory_space<vmem>>, vector<8x1xf32>
      %cst_16 = arith.constant 1.000000e+00 : f32
      %19 = vector.broadcast %cst_16 : f32 to vector<8x1xf32>
      %20 = arith.maximumf %18, %19 : vector<8x1xf32>
      %21 = tpu.reciprocal %20 {approx = true} : vector<8x1xf32> -> vector<8x1xf32>
      %c0_17 = arith.constant 0 : index
      %c0_18 = arith.constant 0 : index
      %22 = vector.load %arg4[%c0_17, %c0_18] : memref<8x128xf32, #tpu.memory_space<vmem>>, vector<8x128xf32>
      %23 = vector.broadcast %21 : vector<8x1xf32> to vector<8x128xf32>
      %24 = arith.mulf %22, %23 : vector<8x128xf32>
      %25 = arith.truncf %24 : vector<8x128xf32> to vector<8x128xbf16>
      %c0_19 = arith.constant 0 : index
      %c0_20 = arith.constant 0 : index
      %26 = vector.load %arg3[%c0_19, %c0_20] : memref<8x128xbf16, #tpu.memory_space<vmem>>, vector<8x128xbf16>
      tpu.vector_store %arg3[%c0_19, %c0_20], %25 {strides = array<i32>} : memref<8x128xbf16, #tpu.memory_space<vmem>>, vector<8x128xbf16>,
    } else {
    }
    return
  }
  func.func @transform_0(%arg0: i32) -> (i32, i32) {
    %c0_i32 = arith.constant 0 : i32
    %c0_i32_0 = arith.constant 0 : i32
    return %c0_i32, %arg0 : i32, i32
  }
  func.func @transform_1(%arg0: i32) -> (i32, i32) {
    %c0_i32 = arith.constant 0 : i32
    %c0_i32_0 = arith.constant 0 : i32
    return %arg0, %c0_i32 : i32, i32
  }
  func.func @transform_2(%arg0: i32) -> (i32, i32) {
    %c0_i32 = arith.constant 0 : i32
    %c0_i32_0 = arith.constant 0 : i32
    %c0_i32_1 = arith.constant 0 : i32
    return %c0_i32, %c0_i32_0 : i32, i32
  }
}

module attributes {stable_mosaic.version = 11 : i64} {
  func.func @_score_kernel(%arg0: i32, %arg1: memref<8x128xbf16, #tpu.memory_space<vmem>>, %arg2: memref<512x128xbf16, #tpu.memory_space<vmem>>, %arg3: memref<8x512xf32, #tpu.memory_space<vmem>>) attributes {dimension_semantics = [#tpu.dimension_semantics<parallel>], iteration_bounds = array<i64: 4>, scalar_prefetch = 0 : i64, scratch_operands = 0 : i64, tpu.core_type = #tpu.core_type<tc>, window_params = [{pipeline_mode = #tpu.pipeline_mode<synchronous>, transform_indices = @transform_0, window_bounds = array<i64: 8, 128>}, {transform_indices = @transform_1, window_bounds = array<i64: 512, 128>}, {transform_indices = @transform_2, window_bounds = array<i64: 8, 512>}]} {
    %c0 = arith.constant 0 : index
    %c0_0 = arith.constant 0 : index
    %0 = vector.load %arg1[%c0, %c0_0] : memref<8x128xbf16, #tpu.memory_space<vmem>>, vector<8x128xbf16>
    %c0_1 = arith.constant 0 : index
    %c0_2 = arith.constant 0 : index
    %1 = vector.load %arg2[%c0_1, %c0_2] : memref<512x128xbf16, #tpu.memory_space<vmem>>, vector<512x128xbf16>
    %cst = arith.constant dense<0.000000e+00> : vector<8x512xf32>
    %2 = tpu.matmul %0, %1, %cst {dimension_numbers = #tpu.dot_dimension_numbers<[1], [1], [0], [0], [0, 0, 1, 0], [], []>} : vector<8x128xbf16>, vector<512x128xbf16>, vector<8x512xf32> -> vector<8x512xf32>
    %c0_3 = arith.constant 0 : index
    %c0_4 = arith.constant 0 : index
    %3 = vector.load %arg3[%c0_3, %c0_4] : memref<8x512xf32, #tpu.memory_space<vmem>>, vector<8x512xf32>
    tpu.vector_store %arg3[%c0_3, %c0_4], %2 {strides = array<i32>} : memref<8x512xf32, #tpu.memory_space<vmem>>, vector<8x512xf32>,
    return
  }
  func.func @transform_0(%arg0: i32) -> (i32, i32) {
    %c0_i32 = arith.constant 0 : i32
    %c0_i32_0 = arith.constant 0 : i32
    %c0_i32_1 = arith.constant 0 : i32
    return %c0_i32, %c0_i32_0 : i32, i32
  }
  func.func @transform_1(%arg0: i32) -> (i32, i32) {
    %c0_i32 = arith.constant 0 : i32
    %c0_i32_0 = arith.constant 0 : i32
    return %arg0, %c0_i32 : i32, i32
  }
  func.func @transform_2(%arg0: i32) -> (i32, i32) {
    %c0_i32 = arith.constant 0 : i32
    %c0_i32_0 = arith.constant 0 : i32
    return %c0_i32, %arg0 : i32, i32
  }
}

</mosaic_0001>

<bundles_post_ra>
// kernel: itemknn_forward.3
= control target key start
LH: loop header
LB: loop body
LE: loop exit
PB: predicated region body
PF: predicated region fallthrough
CT: control target
= control target key end

     0   :  { %7 = vsyncpa [#allocation3], 0  ;;  %s937_s0 = inlined_call_operand.vmem [shape: bf16[8,128], index: 0, kind: input, shape index: {}]   ;;  %s938_s1 = inlined_call_operand.vmem [shape: bf16[2048,128], index: 1, kind: input, shape index: {}]   ;;  %s939_s2 = inlined_call_operand.hbm [shape: f32[8,2048], index: 2, kind: output, shape index: {}]  }
   0x1   :  { %9 = vsyncpa [#allocation3 + $0x1], 0  ;;  %s795_s9 = smov 0   ;;  %s797_s10 = smov 0  }
   0x2   :  { %s799_s11 = smov 0   ;;  %s801_s12 = smov 0  }
   0x3 LB: > { %s816_s13 = sadd.s32 4294967295, %s777_s12   ;;  %s563_s14 = sadd.s32 4294967294, %s777_s12   ;;  %s777_s12 = sphi %s801_s12, %s945_s12   ;;  %s773_s11 = sphi %s799_s11, %s944_s11   ;;  %s769_s10 = sphi %s797_s10, %s943_s10   ;;  %s765_s9 = sphi %s795_s9, %s942_s9  }
   0x4   : > { %s820_s15 = sadd.s32 1, %s777_s12   ;;  %s69_s16 = sadd.s32 1, %s773_s11 }
   0x5   : > { %s66_s17 = ssub.s32 %s777_s12, %s820_s15  ;;  %p79_p0 = scmp.ne.s32.totalorder %s773_s11, %s769_s10 }
   0x6   : > { %p67_p1 = scmp.eq.s32.totalorder %s66_s17, 0  ;;  %p80_p2 = scmp.eq.s32.totalorder %s816_s13, 3 }
   0x7   : > { %p85_p3 = scmp.ne.s32.totalorder %s769_s10, %s765_s9  ;;  %p86_p4 = scmp.eq.s32.totalorder %s563_s14, 3 }
   0x8   : > { %s831_s18 = scalar_select %p67_p1, %s773_s11, %s69_s16  }
   0x9   : > { %p833_p5 = por %p80_p2, %p79_p0  ;;  %p837_p6 = por %p86_p4, %p85_p3 }
   0xa   : > { %p566_p7 = scmp.ge.s32.totalorder %s777_s12, 1  ;;  %p116_p8 = scmp.lt.s32.totalorder %s777_s12, 5 }
   0xc   : > { %p117_p9 = pnand %p566_p7, %p116_p8 }
   0xd   : > { %s568_s21 = sshll.u32 (!%p117_p9), %s816_s13, 6  ;;  %v847_v0 = vld [vmem:[%s937_s0] sm:$0xf] (!%p117_p9)  ;;  %s135_s28 = sand.u32 (!%p117_p9), 1, %s769_s10  }
   0xe   : > { %120 = sbr.rel (%p117_p9) target bundleno = 319 (0x13f), region = 28  ;;  %p139_p10 = scmp.lt.s32.totalorder (!%p117_p9), %s568_s21, 255  ;;  %624 = vmatprep.mubr.bf16.mxu0 (!%p117_p9), %v847_v0  ;;  %642 = vmatprep.mubr.bf16.mxu1 (!%p117_p9), %v847_v0 }
   0xf   : > { %s567_s29 = sshll.u32 (!%p117_p9), %s135_s28, 5  ;;  %s607_s30 = sshll.u32 (!%p117_p9), %s816_s13, 9 }
  0x10   : > { %s137_s3 = scalar_lea.vmem (!%p117_p9), [#allocation2], %s567_s29  ;;  %s895_s7 = scalar_lea.hbm (!%p117_p9), %s939_s2, %s607_s30 }
  0x11   : > { %s504_s4 = sshll.u32 (!%p117_p9), %s137_s3, 4  ;;  %s490_s8 = scalar_lea.sflag (!%p117_p9), [#allocation3], %s135_s28  ;;  %s897_s4 = int_to_ptr.vmem [resolvable:$true] %s504_s4 }
  0x12   : > { %s715_s13 = scalar_lea.vmem (!%p117_p9), %s897_s4, 512  ;;  %s779_s14 = smov (!%p117_p9), [#allocation2]  }
  0x13   : > { %p716_p11 = scmp.ne.s32.totalorder (!%p117_p9), %s897_s4, %s715_s13  ;;  %s719_s16 = sshll.u32 (!%p117_p9), %s779_s14, 4  ;;  %s720_s16 = int_to_ptr.vmem [resolvable:$false] %s719_s16 }
  0x14   : > { %s721_s17 = scalar_lea.vmem (!%p117_p9), %s720_s16, 1024  ;;  %p722_p0 = scmp.lt.s32.totalorder (!%p117_p9), %s897_s4, %s720_s16 }
  0x15   : > { %s947_s21 = smov (!%p139_p10, %s568_s21), 255  ;;  %p717_p12 = pnand %p716_p11, %p833_p5 }
  0x16   : > { %s569_s24 = sshll.u32 %s947_s21, 2  ;;  %p723_p1 = scmp.lt.s32.totalorder %s721_s17, %s715_s13 }
  0x17   : > { %s854_s27 = scalar_lea.vmem %s938_s1, %s569_s24  ;;  %p718_p13 = pneg %p717_p12 }
  0x18   : > { %v683_v1 = vld [vmem:[%s854_s27 + $0x40] sm:$0xff]   ;;  %v687_v5 = vld [vmem:[%s854_s27 + $0x48] sm:$0xff]   ;;  %v691_v9 = vld [vmem:[%s854_s27 + $0x50] sm:$0xff]   ;;  %p724_p2 = por %p723_p1, %p722_p0 }
  0x19   : > { %v684_v2 = vld [vmem:[%s854_s27 + $0xc0] sm:$0xff]   ;;  %608 = vmatprep.subr.bf16.mxu0 %v683_v1  ;;  %v688_v6 = vld [vmem:[%s854_s27 + $0xc8] sm:$0xff]   ;;  %v692_v10 = vld [vmem:[%s854_s27 + $0xd0] sm:$0xff]  }
  0x1a   : > { %v685_v3 = vld [vmem:[%s854_s27] sm:$0xff]   ;;  %626 = vmatprep.subr.bf16.mxu1 %v684_v2  ;;  %v689_v7 = vld [vmem:[%s854_s27 + $0x8] sm:$0xff]   ;;  %v693_v11 = vld [vmem:[%s854_s27 + $0x10] sm:$0xff]   ;;  %p725_p3 = pnand %p724_p2, %p718_p13 }
  0x1b   : > { %v686_v4 = vld [vmem:[%s854_s27 + $0x80] sm:$0xff]   ;;  %609 = vmatpush3.bf16.xpose.msra.mxu0 %v685_v3  ;;  %v690_v8 = vld [vmem:[%s854_s27 + $0x88] sm:$0xff]   ;;  %v694_v12 = vld [vmem:[%s854_s27 + $0x90] sm:$0xff]  }
  0x1c   : > { %627 = vmatpush3.bf16.xpose.msra.mxu1 %v686_v4  ;;  %610 = vmatprep.subr.bf16.mxu0 %v687_v5  ;;  %v695_v13 = vld [vmem:[%s854_s27 + $0x58] sm:$0xff]   ;;  %v699_v17 = vld [vmem:[%s854_s27 + $0x60] sm:$0xff]   ;;  %v703_v21 = vld [vmem:[%s854_s27 + $0x68] sm:$0xff]  }
  0x1d   : > { %628 = vmatprep.subr.bf16.mxu1 %v688_v6  ;;  %v696_v14 = vld [vmem:[%s854_s27 + $0xd8] sm:$0xff]   ;;  %v700_v18 = vld [vmem:[%s854_s27 + $0xe0] sm:$0xff]   ;;  %v704_v22 = vld [vmem:[%s854_s27 + $0xe8] sm:$0xff]  }
  0x1e   : > { %v697_v15 = vld [vmem:[%s854_s27 + $0x18] sm:$0xff]   ;;  %v701_v19 = vld [vmem:[%s854_s27 + $0x20] sm:$0xff]   ;;  %v705_v23 = vld [vmem:[%s854_s27 + $0x28] sm:$0xff]  }
  0x1f   : > { %v698_v16 = vld [vmem:[%s854_s27 + $0x98] sm:$0xff]   ;;  %v702_v20 = vld [vmem:[%s854_s27 + $0xa0] sm:$0xff]   ;;  %v706_v24 = vld [vmem:[%s854_s27 + $0xa8] sm:$0xff]  }
  0x20   : > { %v707_v25 = vld [vmem:[%s854_s27 + $0x70] sm:$0xff]   ;;  %v711_v29 = vld [vmem:[%s854_s27 + $0x78] sm:$0xff]  }
  0x21   : > { %v708_v26 = vld [vmem:[%s854_s27 + $0xf0] sm:$0xff]   ;;  %v712_v30 = vld [vmem:[%s854_s27 + $0xf8] sm:$0xff]  }
  0x22   : > { %v709_v27 = vld [vmem:[%s854_s27 + $0x30] sm:$0xff]   ;;  %v713_v31 = vld [vmem:[%s854_s27 + $0x38] sm:$0xff]  }
  0x23   : > { %611 = vmatpush3.bf16.xpose.msra.mxu0 %v689_v7  ;;  %v710_v28 = vld [vmem:[%s854_s27 + $0xb0] sm:$0xff]   ;;  %v714_v32 = vld [vmem:[%s854_s27 + $0xb8] sm:$0xff]  }
  0x24   : > { %629 = vmatpush3.bf16.xpose.msra.mxu1 %v690_v8  ;;  %612 = vmatprep.subr.bf16.mxu0 %v691_v9 }
  0x25   : > { %630 = vmatprep.subr.bf16.mxu1 %v692_v10 }
  0x2b   : > { %613 = vmatpush3.bf16.xpose.msra.mxu0 %v693_v11 }
  0x2c   : > { %631 = vmatpush3.bf16.xpose.msra.mxu1 %v694_v12  ;;  %614 = vmatprep.subr.bf16.mxu0 %v695_v13 }
  0x2d   : > { %632 = vmatprep.subr.bf16.mxu1 %v696_v14 }
  0x33   : > { %615 = vmatpush3.bf16.xpose.msra.mxu0 %v697_v15 }
  0x34   : > { %633 = vmatpush3.bf16.xpose.msra.mxu1 %v698_v16  ;;  %616 = vmatprep.subr.bf16.mxu0 %v699_v17 }
  0x35   : > { %634 = vmatprep.subr.bf16.mxu1 %v700_v18 }
  0x3b   : > { %617 = vmatpush3.bf16.xpose.msra.mxu0 %v701_v19 }
  0x3c   : > { %635 = vmatpush3.bf16.xpose.msra.mxu1 %v702_v20  ;;  %618 = vmatprep.subr.bf16.mxu0 %v703_v21 }
  0x3d   : > { %636 = vmatprep.subr.bf16.mxu1 %v704_v22 }
  0x43   : > { %619 = vmatpush3.bf16.xpose.msra.mxu0 %v705_v23 }
  0x44   : > { %637 = vmatpush3.bf16.xpose.msra.mxu1 %v706_v24  ;;  %620 = vmatprep.subr.bf16.mxu0 %v707_v25 }
  0x45   : > { %638 = vmatprep.subr.bf16.mxu1 %v708_v26 }
  0x4b   : > { %621 = vmatpush3.bf16.xpose.msra.mxu0 %v709_v27 }
  0x4c   : > { %639 = vmatpush3.bf16.xpose.msra.mxu1 %v710_v28  ;;  %622 = vmatprep.subr.bf16.mxu0 %v711_v29 }
  0x4d   : > { %640 = vmatprep.subr.bf16.mxu1 %v712_v30 }
  0x53   : > { %623 = vmatpush3.bf16.xpose.msra.mxu0 %v713_v31 }
  0x54   : > { %641 = vmatpush3.bf16.xpose.msra.mxu1 %v714_v32 }
  0x5a   : > { %625 = vmatmul.mubr.bf16.vlgmr.msra.gmra.mrb[0].mxu0 %v847_v0 }
  0x5b   : > { %643 = vmatmul.mubr.bf16.vlgmr.msra.gmra.mrb[0].mxu1 %v847_v0 }
 0x12d   : > { %v437_v33 = vpop.f32.mrb[0].mxu0 }
 0x12e   : > { %485 = vst [vmem:[%s137_s3] sm:$0xff] %v437_v33  ;;  %v478_v34 = vpop.f32.mrb[0].mxu1  ;;  %v439_v35 = vpop.f32.mrb[1].mxu0 }
 0x12f   : > { %487 = vst [vmem:[%s137_s3 + $0x10] sm:$0xff] %v478_v34  ;;  %486 = vst [vmem:[%s137_s3 + $0x8] sm:$0xff] %v439_v35  ;;  %v480_v36 = vpop.f32.mrb[1].mxu1  ;;  %v441_v37 = vpop.f32.mrb[2].mxu0 }
 0x130   : > { %488 = vst [vmem:[%s137_s3 + $0x18] sm:$0xff] %v480_v36  ;;  %v482_v38 = vpop.f32.mrb[2].mxu1  ;;  %v442_v39 = vpop.f32.mrb[3].mxu0 }
 0x131   : > { %v483_v40 = vpop.f32.mrb[3].mxu1 }
 0x132   : > { %728 = shalt.err (!%p725_p3)
}
 0x133   : > { %s729_s21 = scalar_lea.hbm %s895_s7, 512  ;;  %s733_s24 = scalar_lea.hbm %s939_s2, 2048 }
 0x134   : > { %p730_p4 = scmp.ne.s32.totalorder %s895_s7, %s729_s21  ;;  %p734_p9 = scmp.lt.u32.totalorder %s895_s7, %s939_s2 }
 0x135   : > { %p735_p10 = scmp.lt.u32.totalorder %s733_s24, %s729_s21  ;;  %p737_p12 = scmp.lt.u32.totalorder %s729_s21, %s895_s7 }
 0x136   : > { %p731_p7 = pnand %p730_p4, %p833_p5 }
 0x137   : > { %p736_p11 = por %p735_p10, %p734_p9 }
 0x138   : > { %p732_p8 = pneg %p731_p7 }
 0x139   : > { %p738_p13 = por %p737_p12, %p736_p11 }
 0x13b   : > { %p739_p0 = pnand %p738_p13, %p732_p8 }
 0x13d   : > { %742 = shalt.err (!%p739_p0)
}
 0x13e   : > { %644 = dma.vmem_to_hbm [thread:$0]  (%p833_p5), %s897_s4, 512, %s895_s7, %s490_s8  }
 0x13f PF: > { %p650_p1 = scmp.ge.s32.totalorder %s777_s12, 2  ;;  %s516_s27 = sand.u32 1, %s765_s9  }
 0x140   : > { %s517_s28 = scalar_lea.sflag [#allocation3], %s516_s27 }
 0x141   : > { %p647_p2 = pnand %p650_p1, %p837_p6 }
 0x143   : > { %760 = dma.done.wait (!%p647_p2), %s517_s28, 512  }
 0x144   : > { %762 = vsyncadd (!%p647_p2), %s517_s28, 4294966784  ;;  %p12_p3 = scmp.ge.s32.totalorder %s820_s15, 6   ;;  %s942_s9 = smov %s769_s10 }
 0x145   : > { %s943_s10 = smov %s773_s11  ;;  %s944_s11 = smov %s831_s18 }
 0x146   : > { %s945_s12 = smov %s820_s15  ;;  %14 = sbr.rel (!%p12_p3) target bundleno = 3 (0x3), region = 63 }
 0x14d   :  { %522 = vsyncpa [#allocation3], 1 }
 0x14e   :  { %524 = vsyncpa [#allocation3 + $0x1], 1 }

// kernel: itemknn_forward.2
= control target key start
LH: loop header
LB: loop body
LE: loop exit
PB: predicated region body
PF: predicated region fallthrough
CT: control target
= control target key end

     0   :  { %s751_s9 = smov 0   ;;  %s815_s0 = inlined_call_operand.vmem [shape: bf16[8,2048], index: 0, kind: input, shape index: {}]   ;;  %s816_s1 = inlined_call_operand.vmem [shape: bf16[2048,128], index: 1, kind: input, shape index: {}]   ;;  %s817_s2 = inlined_call_operand.vmem [shape: bf16[8,128], index: 2, kind: output, shape index: {}]  }
   0x1 LB: > { %s757_s10 = sadd.s32 4294967295, %s732_s9   ;;  %p588_p0 = scmp.ge.s32.totalorder %s732_s9, 1  ;;  %s732_s9 = sphi %s751_s9, %s12_s9  }
   0x2   : > { %p119_p1 = scmp.lt.s32.totalorder %s732_s9, 5 }
   0x4   : > { %p120_p2 = pnand %p588_p0, %p119_p1 }
   0x5   : > { %s589_s11 = sshll.u32 (!%p120_p2), %s757_s10, 2  ;;  %s591_s12 = sshll.u32 (!%p120_p2), %s757_s10, 6 }
   0x6   : > { %123 = sbr.rel (%p120_p2) target bundleno = 338 (0x152), region = 28  ;;  %p142_p3 = scmp.lt.s32.totalorder (!%p120_p2), %s589_s11, 15 }
   0x7   : > { %p148_p4 = scmp.lt.s32.totalorder (!%p120_p2), %s591_s12, 255  ;;  %p593_p5 = scmp.ne.s32.totalorder (!%p120_p2), %s757_s10, 0 }
   0xd   : > { %s819_s11 = smov (!%p142_p3, %s589_s11), 15  ;;  %s821_s12 = smov (!%p148_p4, %s591_s12), 255 }
   0xe   : > { %s590_s13 = sshll.u32 %s819_s11, 2  ;;  %s592_s17 = sshll.u32 %s821_s12, 2  ;;  %vm159_vm0 = vcmask (!%p593_p5), 7168   ;;  %v734_v0 = vmov (!%p593_p5), 0.0  }
   0xf   : > { %s766_s16 = scalar_lea.vmem %s815_s0, %s590_s13  ;;  %s771_s20 = scalar_lea.vmem %s816_s1, %s592_s17  ;;  %158 = vst [vmem:[#allocation2] sm:$0xff] (!%p593_p5), %v734_v0  ;;  %160 = vst.msk [vmem:[#allocation3] sm:$0xff] (!%p593_p5), %vm159_vm0, %v734_v0 }
  0x10   : > { %157 = sbr.rel (%p593_p5) target bundleno = 23 (0x17), region = 32 }
  0x17 PF: > { %v687_v1 = vld [vmem:[%s771_s20 + $0x40] sm:$0xff]   ;;  %v691_v5 = vld [vmem:[%s771_s20 + $0x48] sm:$0xff]   ;;  %v695_v9 = vld [vmem:[%s771_s20 + $0x50] sm:$0xff]   ;;  %vm527_vm1 = vcmask 7168   ;;  %p630_p6 = scmp.ne.s32.totalorder %s757_s10, 3 }
  0x18   : > { %v688_v2 = vld [vmem:[%s771_s20 + $0xc0] sm:$0xff]   ;;  %633 = vmatprep.subr.bf16.mxu0 %v687_v1  ;;  %v692_v6 = vld [vmem:[%s771_s20 + $0xc8] sm:$0xff]   ;;  %v696_v10 = vld [vmem:[%s771_s20 + $0xd0] sm:$0xff]   ;;  %v735_v63 = vmov (!%p630_p6), 0  }
  0x19   : > { %v689_v3 = vld [vmem:[%s771_s20] sm:$0xff]   ;;  %655 = vmatprep.subr.bf16.mxu1 %v688_v2  ;;  %v693_v7 = vld [vmem:[%s771_s20 + $0x8] sm:$0xff]   ;;  %v697_v11 = vld [vmem:[%s771_s20 + $0x10] sm:$0xff]   ;;  %723 = vset.pattern.permute.xlu0 (!%p630_p6), %v735_v63 }
  0x1a   : > { %v690_v4 = vld [vmem:[%s771_s20 + $0x80] sm:$0xff]   ;;  %634 = vmatpush3.bf16.msra.mxu0 %v689_v3  ;;  %v694_v8 = vld [vmem:[%s771_s20 + $0x88] sm:$0xff]   ;;  %v698_v12 = vld [vmem:[%s771_s20 + $0x90] sm:$0xff]  }
  0x1b   : > { %656 = vmatpush3.bf16.msra.mxu1 %v690_v4  ;;  %635 = vmatprep.subr.bf16.mxu0 %v691_v5  ;;  %v699_v13 = vld [vmem:[%s771_s20 + $0x58] sm:$0xff]   ;;  %v703_v17 = vld [vmem:[%s771_s20 + $0x60] sm:$0xff]   ;;  %v707_v21 = vld [vmem:[%s771_s20 + $0x68] sm:$0xff]  }
  0x1c   : > { %657 = vmatprep.subr.bf16.mxu1 %v692_v6  ;;  %v700_v14 = vld [vmem:[%s771_s20 + $0xd8] sm:$0xff]   ;;  %v704_v18 = vld [vmem:[%s771_s20 + $0xe0] sm:$0xff]   ;;  %v708_v22 = vld [vmem:[%s771_s20 + $0xe8] sm:$0xff]  }
  0x1d   : > { %v701_v15 = vld [vmem:[%s771_s20 + $0x18] sm:$0xff]   ;;  %v705_v19 = vld [vmem:[%s771_s20 + $0x20] sm:$0xff]   ;;  %v709_v23 = vld [vmem:[%s771_s20 + $0x28] sm:$0xff]  }
  0x1e   : > { %636 = vmatpush3.bf16.msra.mxu0 %v693_v7  ;;  %v702_v16 = vld [vmem:[%s771_s20 + $0x98] sm:$0xff]   ;;  %v706_v20 = vld [vmem:[%s771_s20 + $0xa0] sm:$0xff]   ;;  %v710_v24 = vld [vmem:[%s771_s20 + $0xa8] sm:$0xff]  }
  0x1f   : > { %658 = vmatpush3.bf16.msra.mxu1 %v694_v8  ;;  %637 = vmatprep.subr.bf16.mxu0 %v695_v9  ;;  %v711_v25 = vld [vmem:[%s771_s20 + $0x70] sm:$0xff]   ;;  %v715_v29 = vld [vmem:[%s771_s20 + $0x78] sm:$0xff]   ;;  %v161_v33 = vld [vmem:[%s766_s16] sm:$0xff] }
  0x20   : > { %659 = vmatprep.subr.bf16.mxu1 %v696_v10  ;;  %v712_v26 = vld [vmem:[%s771_s20 + $0xf0] sm:$0xff]   ;;  %v716_v30 = vld [vmem:[%s771_s20 + $0xf8] sm:$0xff]   ;;  %v162_v34 = vld [vmem:[%s766_s16 + $0x8] sm:$0xff]  ;;  %v595_v35 = vcombine.high %v161_v33, %v161_v33  ;;  %v594_v37 = vcombine.low %v161_v33, %v161_v33  ;;  %v517_v39 = vunpack.c.l.bf16 %v161_v33  ;;  %v518_v40 = vunpack.c.h.bf16 %v161_v33 }
  0x21   : > { %v713_v27 = vld [vmem:[%s771_s20 + $0x30] sm:$0xff]   ;;  %v717_v31 = vld [vmem:[%s771_s20 + $0x38] sm:$0xff]   ;;  %v597_v36 = vcombine.high %v162_v34, %v162_v34  ;;  %v596_v38 = vcombine.low %v162_v34, %v162_v34  ;;  %v519_v41 = vunpack.c.l.bf16 %v162_v34  ;;  %v520_v42 = vunpack.c.h.bf16 %v162_v34  ;;  %v516_v46 = vld [vmem:[#allocation3] sm:$0xff] }
  0x22   : > { %638 = vmatpush3.bf16.msra.mxu0 %v697_v11  ;;  %v714_v28 = vld [vmem:[%s771_s20 + $0xb0] sm:$0xff]   ;;  %v718_v32 = vld [vmem:[%s771_s20 + $0xb8] sm:$0xff]   ;;  %466 = vmatprep.mubr.bf16.mxu0 %v595_v35  ;;  %v521_v43 = vadd.f32 %v518_v40, %v517_v39  ;;  %v227_v57 = vld [vmem:[#allocation2] sm:$0xff] }
  0x23   : > { %660 = vmatpush3.bf16.msra.mxu1 %v698_v12  ;;  %639 = vmatprep.subr.bf16.mxu0 %v699_v13 }
  0x24   : > { %661 = vmatprep.subr.bf16.mxu1 %v700_v14  ;;  %506 = vmatprep.mubr.bf16.mxu1 %v597_v36  ;;  %v522_v44 = vadd.f32 %v521_v43, %v519_v41 }
  0x26   : > { %640 = vmatpush3.bf16.msra.mxu0 %v701_v15  ;;  %v523_v45 = vadd.f32 %v522_v44, %v520_v42 }
  0x27   : > { %662 = vmatpush3.bf16.msra.mxu1 %v702_v16  ;;  %641 = vmatprep.subr.bf16.mxu0 %v703_v17 }
  0x28   : > { %663 = vmatprep.subr.bf16.mxu1 %v704_v18  ;;  %524 = vadd.xlane.f32.xlu0 %v523_v45 }
  0x2a   : > { %642 = vmatpush3.bf16.msra.mxu0 %v705_v19 }
  0x2b   : > { %664 = vmatpush3.bf16.msra.mxu1 %v706_v20  ;;  %643 = vmatprep.subr.bf16.mxu0 %v707_v21 }
  0x2c   : > { %665 = vmatprep.subr.bf16.mxu1 %v708_v22 }
  0x2e   : > { %644 = vmatpush3.bf16.msra.mxu0 %v709_v23 }
  0x2f   : > { %666 = vmatpush3.bf16.msra.mxu1 %v710_v24  ;;  %645 = vmatprep.subr.bf16.mxu0 %v711_v25 }
  0x30   : > { %667 = vmatprep.subr.bf16.mxu1 %v712_v26 }
  0x32   : > { %646 = vmatpush3.bf16.msra.mxu0 %v713_v27 }
  0x33   : > { %668 = vmatpush3.bf16.msra.mxu1 %v714_v28  ;;  %647 = vmatprep.subr.bf16.mxu0 %v715_v29 }
  0x34   : > { %669 = vmatprep.subr.bf16.mxu1 %v716_v30 }
  0x36   : > { %648 = vmatpush3.bf16.msra.mxu0 %v717_v31 }
  0x37   : > { %670 = vmatpush3.bf16.msra.mxu1 %v718_v32 }
  0x39   : > { %467 = vmatmul.mubr.bf16.vlgmr.msra.gmra.mrb[0].mxu0 %v594_v37 }
  0x3a   : > { %507 = vmatmul.mubr.bf16.vlgmr.msra.gmra.mrb[0].mxu1 %v596_v38 }
  0xb5   : > { %v525_v47 = vpop.xlane.xlu0 %524 }
  0xb6   : > { %v526_v48 = vadd.f32 %v525_v47, %v516_v46 }
  0xb8   : > { %528 = vst.msk [vmem:[#allocation3] sm:$0xff] %vm527_vm1, %v526_v48 }
  0xbf   : > { %v533_v62 = vld [vmem:[#allocation3] sm:$0xff] (!%p630_p6) }
  0xc0   : > { %v534_v0 = vmax.f32 (!%p630_p6), %v533_v62, 1.0 }
  0xc2   : > { %724 = vrcp.f32 (!%p630_p6), %v534_v0 }
  0xcc   : > { %v725_v1 = vpop.eup (!%p630_p6), %724 }
  0xcd   : > { %539 = vperm.xlu0 (!%p630_p6), %723, %v725_v1  }
 0x10c   : > { %v649_v49 = vpop.f32.mrb[0].mxu0 }
 0x10d   : > { %v671_v50 = vpop.f32.mrb[0].mxu1  ;;  %v650_v51 = vpop.f32.mrb[1].mxu0 }
 0x10e   : > { %v672_v52 = vpop.f32.mrb[1].mxu1  ;;  %v651_v53 = vadd.f32 %v650_v51, %v649_v49  ;;  %v652_v55 = vpop.f32.mrb[2].mxu0 }
 0x10f   : > { %v673_v54 = vadd.f32 %v672_v52, %v671_v50  ;;  %v674_v56 = vpop.f32.mrb[2].mxu1  ;;  %v653_v58 = vpop.f32.mrb[3].mxu0  ;;  %532 = sbr.rel (%p630_p6) target bundleno = 338 (0x152), region = 36 }
 0x110   : > { %v675_v59 = vpop.f32.mrb[3].mxu1 }
 0x111   : > { %v509_v60 = vadd.f32 %v673_v54, %v651_v53 }
 0x113   : > { %v514_v61 = vadd.f32 %v509_v60, %v227_v57 }
 0x115   : > { %515 = vst [vmem:[#allocation2] sm:$0xff] %v514_v61 }
 0x11c   : > { %v536_v2 = vld [vmem:[#allocation2] sm:$0xff] }
 0x14c   : > { %v540_v3 = vpop.permute.xlu0 %539 }
 0x14d   : > { %v542_v4 = vmul.f32 %v540_v3, %v536_v2 }
 0x14f   : > { %v543_v5 = vpack.c.bf16 %v542_v4, %v542_v4 }
 0x151   : > { %544 = vst [vmem:[%s817_s2] sm:$0xf] %v543_v5 }
 0x152 PF: > { %s12_s9 = sadd.s32 1, %s732_s9  }
 0x153   : > { %p9_p7 = scmp.ge.s32.totalorder %s12_s9, 6  }
 0x155   :  { %11 = sbr.rel (!%p9_p7) target bundleno = 1 (0x1), region = 65 }

</bundles_post_ra>
